<compile_context>
chip_gen: v6e
topology: v6e:2x2x1
jax: 0.10.0
libtpu: 0.0.40
codegen_flags: <defaults>
</compile_context>

<pallas_src>
import functools

import jax
import jax.numpy as jnp
from jax import lax
from jax.experimental import pallas as pl
from jax.experimental.pallas import tpu as pltpu


def _head_kernel(xq_ref, xkv_ref, w_ref, o_ref,
                 q_sc, m_sc, l_sc, acc_sc,
                 *, tq, tk, hp, scale):
    # xq_ref:  (1, tq, C)   rows of x for this q block
    # xkv_ref: (1, tk, C)   rows of x for this kv block
    # w_ref:   (C, 3*hp)    bf16 fused [q | k | v] weights, zero-padded to hp lanes each
    # o_ref:   (1, tq, hp)
    qi = pl.program_id(1)
    ki = pl.program_id(2)
    q_start = qi * tq
    kv_start = ki * tk

    @pl.when(ki == 0)
    def _init():
        m_sc[...] = jnp.full((tq, 1), -jnp.inf, jnp.float32)
        l_sc[...] = jnp.zeros((tq, 1), jnp.float32)
        acc_sc[...] = jnp.zeros((tq, hp), jnp.float32)
        xq = xq_ref[0].astype(jnp.bfloat16)                      # (tq, C)
        q_sc[...] = jnp.dot(xq, w_ref[:, 0:hp],
                            preferred_element_type=jnp.float32).astype(jnp.bfloat16)

    # Skip kv blocks that lie entirely above the causal diagonal.
    @pl.when(kv_start <= q_start + tq - 1)
    def _compute():
        xkv = xkv_ref[0].astype(jnp.bfloat16)                    # (tk, C)
        k = jnp.dot(xkv, w_ref[:, hp:2 * hp],
                    preferred_element_type=jnp.float32)          # (tk, hp) f32
        v = jnp.dot(xkv, w_ref[:, 2 * hp:3 * hp],
                    preferred_element_type=jnp.float32)          # (tk, hp) f32

        # s = q @ k^T, contracting on the (padded) head dim -- no explicit transpose.
        s = lax.dot_general(q_sc[...], k.astype(jnp.bfloat16),
                            dimension_numbers=(((1,), (1,)), ((), ())),
                            preferred_element_type=jnp.float32) * scale    # (tq, tk)

        row = q_start + lax.broadcasted_iota(jnp.int32, (tq, tk), 0)
        col = kv_start + lax.broadcasted_iota(jnp.int32, (tq, tk), 1)
        s = jnp.where(row >= col, s, -jnp.inf)                   # causal (tril) mask

        # Online softmax (f32).
        m_prev = m_sc[...]
        m_new = jnp.maximum(m_prev, jnp.max(s, axis=-1, keepdims=True))
        alpha = jnp.exp(m_prev - m_new)
        p = jnp.exp(s - m_new)
        l_sc[...] = alpha * l_sc[...] + jnp.sum(p, axis=-1, keepdims=True)
        acc_sc[...] = alpha * acc_sc[...] + jnp.dot(
            p.astype(jnp.bfloat16), v.astype(jnp.bfloat16),
            preferred_element_type=jnp.float32)
        m_sc[...] = m_new

    @pl.when(ki == pl.num_programs(2) - 1)
    def _finalize():
        inv_l = pl.reciprocal(l_sc[...], approx=True)
        o_ref[0] = (acc_sc[...] * inv_l).astype(o_ref.dtype)


def _round_up(n, m):
    return ((n + m - 1) // m) * m


@functools.partial(jax.jit, static_argnames=("block_q", "block_k"))
def head_forward(x, w_key, w_query, w_value, *, block_q=128, block_k=128):
    """x: (B, T, C) f32; w_*: (C, H) -> (B, T, H). Matches PyTorch Head.forward (eval)."""
    B, T, C = x.shape
    H = w_key.shape[-1]
    Hp = _round_up(max(H, 128), 128)            # lane-dense padded head size

    tq = min(block_q, T)
    tk = min(block_k, T)
    assert T % tq == 0 and T % tk == 0, "T must be divisible by the tile sizes"
    nq, nk = T // tq, T // tk

    # Fused, zero-padded QKV weight (bf16): cols [0,H)=query, [Hp,Hp+H)=key, [2Hp,2Hp+H)=value.
    w_qkv = jnp.zeros((C, 3 * Hp), jnp.bfloat16)
    w_qkv = w_qkv.at[:, 0:H].set(w_query.astype(jnp.bfloat16))
    w_qkv = w_qkv.at[:, Hp:Hp + H].set(w_key.astype(jnp.bfloat16))
    w_qkv = w_qkv.at[:, 2 * Hp:2 * Hp + H].set(w_value.astype(jnp.bfloat16))

    kernel = functools.partial(
        _head_kernel, tq=tq, tk=tk, hp=Hp,
        scale=float(C) ** (-0.5))  # note: scales by d_model (C), as in the PyTorch reference

    out_padded = pl.pallas_call(
        kernel,
        out_shape=jax.ShapeDtypeStruct((B, T, Hp), x.dtype),
        grid_spec=pltpu.PrefetchScalarGridSpec(
            num_scalar_prefetch=0,
            grid=(B, nq, nk),
            in_specs=[
                pl.BlockSpec((1, tq, C), lambda b, qi, ki: (b, qi, 0)),   # x rows for q
                pl.BlockSpec((1, tk, C), lambda b, qi, ki: (b, ki, 0)),   # x rows for k/v
                pl.BlockSpec((C, 3 * Hp), lambda b, qi, ki: (0, 0)),      # resident fused weights
            ],
            out_specs=pl.BlockSpec((1, tq, Hp), lambda b, qi, ki: (b, qi, 0)),
            scratch_shapes=[
                pltpu.VMEM((tq, Hp), jnp.bfloat16),   # projected q, reused across kv steps
                pltpu.VMEM((tq, 1), jnp.float32),     # running max m
                pltpu.VMEM((tq, 1), jnp.float32),     # running denominator l
                pltpu.VMEM((tq, Hp), jnp.float32),    # output accumulator
            ],
        ),
        compiler_params=pltpu.CompilerParams(
            dimension_semantics=("parallel", "parallel", "arbitrary"),
        ),
    )(x, x, w_qkv)
    return out_padded[..., :H]


def _reference(x, w_key, w_query, w_value):
    """Pure-JAX reference mirroring the PyTorch forward (eval mode), in f32."""
    B, T, C = x.shape
    k = x @ w_key
    q = x @ w_query
    v = x @ w_value
    wei = (q @ jnp.swapaxes(k, -2, -1)) * C ** (-0.5)
    tril = jnp.tril(jnp.ones((T, T), dtype=bool))
    wei = jnp.where(tril, wei, -jnp.inf)
    wei = jax.nn.softmax(wei, axis=-1)
    return wei @ v


if __name__ == "__main__":
    # Small, module-consistent shapes: batch, seq (== block_size), d_model, head_size.
    B, T, C, H = 2, 8, 32, 16

    key = jax.random.PRNGKey(0)
    kx, kk, kq, kv = jax.random.split(key, 4)

    x = jax.random.normal(kx, (B, T, C), dtype=jnp.float32)
    # Deterministic "Linear(d_model, head_size, bias=False)" weights, stored as (C, H).
    w_key = jax.random.normal(kk, (C, H), dtype=jnp.float32) * (1.0 / jnp.sqrt(C))
    w_query = jax.random.normal(kq, (C, H), dtype=jnp.float32) * (1.0 / jnp.sqrt(C))
    w_value = jax.random.normal(kv, (C, H), dtype=jnp.float32) * (1.0 / jnp.sqrt(C))

    out = head_forward(x, w_key, w_query, w_value)
    out = jax.block_until_ready(out)

    ref = _reference(x, w_query=w_query, w_key=w_key, w_value=w_value)
    assert out.shape == (B, T, H)
    # bf16 MXU operands + approx reciprocal loosen the tolerance vs. the f32 reference.
    assert jnp.allclose(out, ref, atol=5e-2, rtol=5e-2), "mismatch vs reference"

    print("KERNEL_OK")
</pallas_src>

<mosaic_0001>
module attributes {stable_mosaic.version = 11 : i64} {
  func.func @_head_kernel(%arg0: i32, %arg1: i32, %arg2: i32, %arg3: memref<1x8x32xf32, #tpu.memory_space<vmem>>, %arg4: memref<1x8x32xf32, #tpu.memory_space<vmem>>, %arg5: memref<32x384xbf16, #tpu.memory_space<vmem>>, %arg6: memref<1x8x128xf32, #tpu.memory_space<vmem>>, %arg7: memref<8x128xbf16, #tpu.memory_space<vmem>>, %arg8: memref<8x1xf32, #tpu.memory_space<vmem>>, %arg9: memref<8x1xf32, #tpu.memory_space<vmem>>, %arg10: memref<8x128xf32, #tpu.memory_space<vmem>>) attributes {dimension_semantics = [#tpu.dimension_semantics<parallel>, #tpu.dimension_semantics<parallel>, #tpu.dimension_semantics<arbitrary>], iteration_bounds = array<i64: 2, 1, 1>, scalar_prefetch = 0 : i64, scratch_operands = 4 : i64, tpu.core_type = #tpu.core_type<tc>, window_params = [{transform_indices = @transform_0, window_bounds = array<i64: 1, 8, 32>}, {transform_indices = @transform_1, window_bounds = array<i64: 1, 8, 32>}, {pipeline_mode = #tpu.pipeline_mode<synchronous>, transform_indices = @transform_2, window_bounds = array<i64: 32, 384>}, {transform_indices = @transform_3, window_bounds = array<i64: 1, 8, 128>}]} {
    %c8_i32 = arith.constant 8 : i32
    %0 = arith.muli %arg1, %c8_i32 : i32
    %c8_i32_0 = arith.constant 8 : i32
    %1 = arith.muli %arg2, %c8_i32_0 : i32
    %c0_i32 = arith.constant 0 : i32
    %2 = arith.cmpi eq, %arg2, %c0_i32 : i32
    %3 = arith.extui %2 : i1 to i32
    %c0_i32_1 = arith.constant 0 : i32
    %4 = arith.cmpi ne, %3, %c0_i32_1 : i32
    scf.if %4 {
      %cst = arith.constant 0xFF800000 : f32
      %13 = vector.broadcast %cst : f32 to vector<8x1xf32>
      %c0 = arith.constant 0 : index
      %c0_6 = arith.constant 0 : index
      %14 = vector.load %arg8[%c0, %c0_6] : memref<8x1xf32, #tpu.memory_space<vmem>>, vector<8x1xf32>
      tpu.vector_store %arg8[%c0, %c0_6], %13 {strides = array<i32>} : memref<8x1xf32, #tpu.memory_space<vmem>>, vector<8x1xf32>,
      %cst_7 = arith.constant 0.000000e+00 : f32
      %15 = vector.broadcast %cst_7 : f32 to vector<8x1xf32>
      %c0_8 = arith.constant 0 : index
      %c0_9 = arith.constant 0 : index
      %16 = vector.load %arg9[%c0_8, %c0_9] : memref<8x1xf32, #tpu.memory_space<vmem>>, vector<8x1xf32>
      tpu.vector_store %arg9[%c0_8, %c0_9], %15 {strides = array<i32>} : memref<8x1xf32, #tpu.memory_space<vmem>>, vector<8x1xf32>,
      %cst_10 = arith.constant 0.000000e+00 : f32
      %17 = vector.broadcast %cst_10 : f32 to vector<8x128xf32>
      %c0_11 = arith.constant 0 : index
      %c0_12 = arith.constant 0 : index
      %18 = vector.load %arg10[%c0_11, %c0_12] : memref<8x128xf32, #tpu.memory_space<vmem>>, vector<8x128xf32>
      tpu.vector_store %arg10[%c0_11, %c0_12], %17 {strides = array<i32>} : memref<8x128xf32, #tpu.memory_space<vmem>>, vector<8x128xf32>,
      %c0_13 = arith.constant 0 : index
      %c0_14 = arith.constant 0 : index
      %c0_15 = arith.constant 0 : index
      %19 = vector.load %arg3[%c0_13, %c0_14, %c0_15] : memref<1x8x32xf32, #tpu.memory_space<vmem>>, vector<1x8x32xf32>
      %20 = vector.shape_cast %19 : vector<1x8x32xf32> to vector<8x32xf32>
      %21 = arith.truncf %20 : vector<8x32xf32> to vector<8x32xbf16>
      %c0_16 = arith.constant 0 : index
      %c0_17 = arith.constant 0 : index
      %22 = vector.load %arg5[%c0_16, %c0_17] : memref<32x384xbf16, #tpu.memory_space<vmem>>, vector<32x128xbf16>
      %cst_18 = arith.constant dense<0.000000e+00> : vector<8x128xf32>
      %23 = tpu.matmul %21, %22, %cst_18 {dimension_numbers = #tpu.dot_dimension_numbers<[1], [0], [0], [1], [0, 0, 1, 1], [], []>} : vector<8x32xbf16>, vector<32x128xbf16>, vector<8x128xf32> -> vector<8x128xf32>
      %24 = arith.truncf %23 : vector<8x128xf32> to vector<8x128xbf16>
      %c0_19 = arith.constant 0 : index
      %c0_20 = arith.constant 0 : index
      %25 = vector.load %arg7[%c0_19, %c0_20] : memref<8x128xbf16, #tpu.memory_space<vmem>>, vector<8x128xbf16>
      tpu.vector_store %arg7[%c0_19, %c0_20], %24 {strides = array<i32>} : memref<8x128xbf16, #tpu.memory_space<vmem>>, vector<8x128xbf16>,
    } else {
    }
    %c8_i32_2 = arith.constant 8 : i32
    %5 = arith.addi %0, %c8_i32_2 : i32
    %c1_i32 = arith.constant 1 : i32
    %6 = arith.subi %5, %c1_i32 : i32
    %7 = arith.cmpi sle, %1, %6 : i32
    %8 = arith.extui %7 : i1 to i32
    %c0_i32_3 = arith.constant 0 : i32
    %9 = arith.cmpi ne, %8, %c0_i32_3 : i32
    scf.if %9 {
      %c0 = arith.constant 0 : index
      %c0_6 = arith.constant 0 : index
      %c0_7 = arith.constant 0 : index
      %13 = vector.load %arg4[%c0, %c0_6, %c0_7] : memref<1x8x32xf32, #tpu.memory_space<vmem>>, vector<1x8x32xf32>
      %14 = vector.shape_cast %13 : vector<1x8x32xf32> to vector<8x32xf32>
      %15 = arith.truncf %14 : vector<8x32xf32> to vector<8x32xbf16>
      %c0_8 = arith.constant 0 : index
      %c128 = arith.constant 128 : index
      %16 = vector.load %arg5[%c0_8, %c128] : memref<32x384xbf16, #tpu.memory_space<vmem>>, vector<32x128xbf16>
      %cst = arith.constant dense<0.000000e+00> : vector<8x128xf32>
      %17 = tpu.matmul %15, %16, %cst {dimension_numbers = #tpu.dot_dimension_numbers<[1], [0], [0], [1], [0, 0, 1, 1], [], []>} : vector<8x32xbf16>, vector<32x128xbf16>, vector<8x128xf32> -> vector<8x128xf32>
      %c0_9 = arith.constant 0 : index
      %c256 = arith.constant 256 : index
      %18 = vector.load %arg5[%c0_9, %c256] : memref<32x384xbf16, #tpu.memory_space<vmem>>, vector<32x128xbf16>
      %cst_10 = arith.constant dense<0.000000e+00> : vector<8x128xf32>
      %19 = tpu.matmul %15, %18, %cst_10 {dimension_numbers = #tpu.dot_dimension_numbers<[1], [0], [0], [1], [0, 0, 1, 1], [], []>} : vector<8x32xbf16>, vector<32x128xbf16>, vector<8x128xf32> -> vector<8x128xf32>
      %c0_11 = arith.constant 0 : index
      %c0_12 = arith.constant 0 : index
      %20 = vector.load %arg7[%c0_11, %c0_12] : memref<8x128xbf16, #tpu.memory_space<vmem>>, vector<8x128xbf16>
      %21 = arith.truncf %17 : vector<8x128xf32> to vector<8x128xbf16>
      %cst_13 = arith.constant dense<0.000000e+00> : vector<8x8xf32>
      %22 = tpu.matmul %20, %21, %cst_13 {dimension_numbers = #tpu.dot_dimension_numbers<[1], [1], [0], [0], [0, 0, 1, 0], [], []>} : vector<8x128xbf16>, vector<8x128xbf16>, vector<8x8xf32> -> vector<8x8xf32>
      %cst_14 = arith.constant 0.176776692 : f32
      %23 = vector.broadcast %cst_14 : f32 to vector<8x8xf32>
      %24 = arith.mulf %22, %23 : vector<8x8xf32>
      %25 = tpu.iota {dimensions = array<i32: 0>} : vector<8x8xi32>
      %26 = vector.broadcast %0 : i32 to vector<8x8xi32>
      %27 = arith.addi %26, %25 : vector<8x8xi32>
      %28 = tpu.iota {dimensions = array<i32: 1>} : vector<8x8xi32>
      %29 = vector.broadcast %1 : i32 to vector<8x8xi32>
      %30 = arith.addi %29, %28 : vector<8x8xi32>
      %31 = arith.cmpi sge, %27, %30 : vector<8x8xi32>
      %cst_15 = arith.constant 0xFF800000 : f32
      %32 = vector.broadcast %cst_15 : f32 to vector<8x8xf32>
      %33 = arith.select %31, %24, %32 : vector<8x8xi1>, vector<8x8xf32>
      %c0_16 = arith.constant 0 : index
      %c0_17 = arith.constant 0 : index
      %34 = vector.load %arg8[%c0_16, %c0_17] : memref<8x1xf32, #tpu.memory_space<vmem>>, vector<8x1xf32>
      %cst_18 = arith.constant dense<0xFF800000> : vector<8xf32>
      %35 = vector.multi_reduction <maximumf>, %33, %cst_18 [1] : vector<8x8xf32> to vector<8xf32>
      %36 = vector.shape_cast %35 : vector<8xf32> to vector<8x1xf32>
      %37 = arith.maximumf %34, %36 : vector<8x1xf32>
      %38 = arith.subf %34, %37 : vector<8x1xf32>
      %39 = math.exp %38 : vector<8x1xf32>
      %40 = vector.broadcast %37 : vector<8x1xf32> to vector<8x8xf32>
      %41 = arith.subf %33, %40 : vector<8x8xf32>
      %42 = math.exp %41 : vector<8x8xf32>
      %c0_19 = arith.constant 0 : index
      %c0_20 = arith.constant 0 : index
      %43 = vector.load %arg9[%c0_19, %c0_20] : memref<8x1xf32, #tpu.memory_space<vmem>>, vector<8x1xf32>
      %44 = arith.mulf %39, %43 : vector<8x1xf32>
      %cst_21 = arith.constant dense<0.000000e+00> : vector<8xf32>
      %45 = vector.multi_reduction <add>, %42, %cst_21 [1] : vector<8x8xf32> to vector<8xf32>
      %46 = vector.shape_cast %45 : vector<8xf32> to vector<8x1xf32>
      %47 = arith.addf %44, %46 : vector<8x1xf32>
      %c0_22 = arith.constant 0 : index
      %c0_23 = arith.constant 0 : index
      %48 = vector.load %arg9[%c0_22, %c0_23] : memref<8x1xf32, #tpu.memory_space<vmem>>, vector<8x1xf32>
      tpu.vector_store %arg9[%c0_22, %c0_23], %47 {strides = array<i32>} : memref<8x1xf32, #tpu.memory_space<vmem>>, vector<8x1xf32>,
      %c0_24 = arith.constant 0 : index
      %c0_25 = arith.constant 0 : index
      %49 = vector.load %arg10[%c0_24, %c0_25] : memref<8x128xf32, #tpu.memory_space<vmem>>, vector<8x128xf32>
      %50 = vector.broadcast %39 : vector<8x1xf32> to vector<8x128xf32>
      %51 = arith.mulf %50, %49 : vector<8x128xf32>
      %52 = arith.truncf %42 : vector<8x8xf32> to vector<8x8xbf16>
      %53 = arith.truncf %19 : vector<8x128xf32> to vector<8x128xbf16>
      %cst_26 = arith.constant dense<0.000000e+00> : vector<8x128xf32>
      %54 = tpu.matmul %52, %53, %cst_26 {dimension_numbers = #tpu.dot_dimension_numbers<[1], [0], [0], [1], [0, 0, 1, 1], [], []>} : vector<8x8xbf16>, vector<8x128xbf16>, vector<8x128xf32> -> vector<8x128xf32>
      %55 = arith.addf %51, %54 : vector<8x128xf32>
      %c0_27 = arith.constant 0 : index
      %c0_28 = arith.constant 0 : index
      %56 = vector.load %arg10[%c0_27, %c0_28] : memref<8x128xf32, #tpu.memory_space<vmem>>, vector<8x128xf32>
      tpu.vector_store %arg10[%c0_27, %c0_28], %55 {strides = array<i32>} : memref<8x128xf32, #tpu.memory_space<vmem>>, vector<8x128xf32>,
      %c0_29 = arith.constant 0 : index
      %c0_30 = arith.constant 0 : index
      %57 = vector.load %arg8[%c0_29, %c0_30] : memref<8x1xf32, #tpu.memory_space<vmem>>, vector<8x1xf32>
      tpu.vector_store %arg8[%c0_29, %c0_30], %37 {strides = array<i32>} : memref<8x1xf32, #tpu.memory_space<vmem>>, vector<8x1xf32>,
    } else {
    }
    %c0_i32_4 = arith.constant 0 : i32
    %10 = arith.cmpi eq, %arg2, %c0_i32_4 : i32
    %11 = arith.extui %10 : i1 to i32
    %c0_i32_5 = arith.constant 0 : i32
    %12 = arith.cmpi ne, %11, %c0_i32_5 : i32
    scf.if %12 {
      %c0 = arith.constant 0 : index
      %c0_6 = arith.constant 0 : index
      %13 = vector.load %arg9[%c0, %c0_6] : memref<8x1xf32, #tpu.memory_space<vmem>>, vector<8x1xf32>
      %14 = tpu.reciprocal %13 {approx = true} : vector<8x1xf32> -> vector<8x1xf32>
      %c0_7 = arith.constant 0 : index
      %c0_8 = arith.constant 0 : index
      %15 = vector.load %arg10[%c0_7, %c0_8] : memref<8x128xf32, #tpu.memory_space<vmem>>, vector<8x128xf32>
      %16 = vector.broadcast %14 : vector<8x1xf32> to vector<8x128xf32>
      %17 = arith.mulf %15, %16 : vector<8x128xf32>
      %c0_9 = arith.constant 0 : index
      %c0_10 = arith.constant 0 : index
      %c0_11 = arith.constant 0 : index
      %18 = vector.load %arg6[%c0_9, %c0_10, %c0_11] : memref<1x8x128xf32, #tpu.memory_space<vmem>>, vector<1x8x128xf32>
      %19 = vector.shape_cast %18 : vector<1x8x128xf32> to vector<8x128xf32>
      %20 = vector.shape_cast %17 : vector<8x128xf32> to vector<1x8x128xf32>
      tpu.vector_store %arg6[%c0_9, %c0_10, %c0_11], %20 {strides = array<i32>} : memref<1x8x128xf32, #tpu.memory_space<vmem>>, vector<1x8x128xf32>,
    } else {
    }
    return
  }
  func.func @transform_0(%arg0: i32, %arg1: i32, %arg2: i32) -> (i32, i32, i32) {
    %c0_i32 = arith.constant 0 : i32
    %c0_i32_0 = arith.constant 0 : i32
    return %arg0, %arg1, %c0_i32 : i32, i32, i32
  }
  func.func @transform_1(%arg0: i32, %arg1: i32, %arg2: i32) -> (i32, i32, i32) {
    %c0_i32 = arith.constant 0 : i32
    %c0_i32_0 = arith.constant 0 : i32
    return %arg0, %arg2, %c0_i32 : i32, i32, i32
  }
  func.func @transform_2(%arg0: i32, %arg1: i32, %arg2: i32) -> (i32, i32) {
    %c0_i32 = arith.constant 0 : i32
    %c0_i32_0 = arith.constant 0 : i32
    %c0_i32_1 = arith.constant 0 : i32
    return %c0_i32, %c0_i32_0 : i32, i32
  }
  func.func @transform_3(%arg0: i32, %arg1: i32, %arg2: i32) -> (i32, i32, i32) {
    %c0_i32 = arith.constant 0 : i32
    %c0_i32_0 = arith.constant 0 : i32
    return %arg0, %arg1, %c0_i32 : i32, i32, i32
  }
}

</mosaic_0001>

<bundles_post_ra>
// kernel: head_forward.1
= control target key start
LH: loop header
LB: loop body
LE: loop exit
PB: predicated region body
PF: predicated region fallthrough
CT: control target
= control target key end

     0   :  { %8 = vsyncpa [#allocation7], 0  ;;  %s1060_s0 = inlined_call_operand.vmem [shape: f32[2,8,32], index: 0, kind: input, shape index: {}, may-alias: {0,1}]   ;;  %s1061_s1 = inlined_call_operand.vmem [shape: f32[2,8,32], index: 1, kind: input, shape index: {}, may-alias: {0,1}]   ;;  %s1062_s2 = inlined_call_operand.vmem [shape: bf16[32,384], index: 2, kind: input, shape index: {}]   ;;  %s1063_s3 = inlined_call_operand.hbm [shape: f32[2,8,128], index: 3, kind: output, shape index: {}]  }
   0x1   :  { %10 = vsyncpa [#allocation7 + $0x1], 0  ;;  %s925_s12 = smov 0   ;;  %s927_s13 = smov 0  }
   0x2   :  { %s929_s14 = smov 0   ;;  %s931_s15 = smov 0  }
   0x3   :  { %s933_s16 = smov 0   ;;  %s935_s17 = smov 0  }
   0x4 LB: > { %s678_s18 = sadd.s32 4294967295, %s898_s17   ;;  %s679_s19 = sadd.s32 4294967294, %s898_s17   ;;  %s898_s17 = sphi %s935_s17, %s16_s17   ;;  %s894_s16 = sphi %s933_s16, %s1070_s16   ;;  %s890_s15 = sphi %s931_s15, %s1069_s15   ;;  %s886_s14 = sphi %s929_s14, %s1068_s14   ;;  %s882_s13 = sphi %s927_s13, %s1067_s13   ;;  %s878_s12 = sphi %s925_s12, %s1066_s12  }
   0x5   : > { %s35_s20 = sadd.s32 1, %s894_s16  ;;  %s121_s21 = sadd.s32 1, %s886_s14 }
   0x6   : > { %p37_p0 = scmp.ge.s32.totalorder %s35_s20, 2  ;;  %p131_p1 = scmp.ne.s32.totalorder %s886_s14, %s882_s13 }
   0x7   : > { %p132_p2 = scmp.eq.s32.totalorder %s678_s18, 1  ;;  %p137_p3 = scmp.ne.s32.totalorder %s882_s13, %s878_s12 }
   0x8   : > { %s1072_s20 = smov (%p37_p0, %s35_s20), 0  ;;  %p138_p5 = scmp.eq.s32.totalorder %s679_s19, 1 }
   0x9   : > { %p965_p4 = por %p132_p2, %p131_p1  ;;  %s116_s23 = ssub.s32 %s894_s16, %s1072_s20 }
   0xa   : > { %p682_p6 = scmp.ge.s32.totalorder %s898_s17, 1  ;;  %p119_p7 = scmp.eq.s32.totalorder %s116_s23, 0 }
   0xb   : > { %p972_p8 = por %p138_p5, %p137_p3  ;;  %p179_p9 = scmp.lt.s32.totalorder %s898_s17, 3 }
   0xc   : > { %s978_s25 = scalar_select %p119_p7, %s886_s14, %s121_s21  }
   0xd   : > { %p180_p10 = pnand %p682_p6, %p179_p9 }
   0xe   : > { %p212_p11 = scmp.lt.s32.totalorder (!%p180_p10), %s890_s15, 1  ;;  %s209_s29 = sand.u32 (!%p180_p10), 1, %s882_s13  }
   0xf   : > { %183 = sbr.rel (%p180_p10) target bundleno = 1014 (0x3f6), region = 32  ;;  %s683_s30 = sshll.u32 (!%p180_p10), %s209_s29, 3 }
  0x10   : > { %s697_s4 = sshll.u32 (!%p180_p10), %s890_s15, 7  ;;  %s211_s5 = scalar_lea.vmem (!%p180_p10), [#allocation6], %s683_s30 }
  0x11   : > { %s589_s6 = sshll.u32 (!%p180_p10), %s211_s5, 4  ;;  %s587_s9 = scalar_lea.hbm (!%p180_p10), %s1063_s3, %s697_s4  ;;  %s590_s6 = int_to_ptr.vmem [resolvable:$true] %s589_s6 }
  0x12   : > { %s575_s10 = scalar_lea.sflag (!%p180_p10), [#allocation7], %s209_s29  ;;  %s904_s18 = smov (!%p180_p10), [#allocation6]  }
  0x13   : > { %s826_s19 = sshll.u32 (!%p180_p10), %s904_s18, 4  ;;  %s827_s19 = int_to_ptr.vmem [resolvable:$false] %s826_s19 }
  0x14   : > { %v900_v0 = vmov 0.0   ;;  %v810_v1 = vld [vmem:[%s1062_s2 + $0x18] ss:$12 sps:$4 sm:$0xff]   ;;  %v811_v2 = vld [vmem:[%s1062_s2 + $0x1c] ss:$12 sps:$4 sm:$0xff]   ;;  %vm901_vm0 = vmmov 0   ;;  %v467_v23 = vlaneseq  ;;  %p829_p1 = scmp.lt.s32.totalorder %s590_s6, %s827_s19 }
  0x15   : > { %713 = vmatprep.subr.bf16.mxu0 %v900_v0  ;;  %721 = vmatprep.subr.bf16.mxu1 %v900_v0  ;;  %v812_v3 = vld [vmem:[%s1062_s2] ss:$12 sps:$4 sm:$0xff]   ;;  %v813_v4 = vld [vmem:[%s1062_s2 + $0x4] ss:$12 sps:$4 sm:$0xff]   ;;  %s213_s7 = scalar_select %p212_p11, %s890_s15, 1  ;;  %vm255_vm1 = vcmask 261120  }
  0x16   : > { %717 = vmatprep.mubr.msk.bf16.mxu0 %vm901_vm0, %v900_v0  ;;  %725 = vmatprep.mubr.msk.bf16.mxu1 %vm901_vm0, %v900_v0  ;;  %v814_v20 = vld [vmem:[%s1062_s2 + $0x20] ss:$12 sps:$4 sm:$0xff]   ;;  %vm233_vm2 = vcmask 7168   ;;  %v902_v21 = vmov -inf   ;;  %v815_v22 = vld [vmem:[%s1062_s2 + $0x8] ss:$12 sps:$4 sm:$0xff]  }
  0x17   : > { %714 = vmatpush3.bf16.msra.mxu0 %v810_v1  ;;  %722 = vmatpush3.bf16.msra.mxu1 %v811_v2  ;;  %s684_s8 = sshll.u32 %s213_s7, 3  ;;  %234 = vst.msk [vmem:[#allocation3] sm:$0xff] %vm233_vm2, %v902_v21  ;;  %235 = vst.msk [vmem:[#allocation4] sm:$0xff] %vm233_vm2, %v900_v0  ;;  %v468_v24 = vshrl.u32 %v467_v23, 7  ;;  %v472_v25 = vand.u32 127, %v467_v23  ;;  %vm478_vm4 = vcmask 64512  }
  0x18   : > { %715 = vmatprep.subr.bf16.mxu0 %v900_v0  ;;  %723 = vmatprep.subr.bf16.mxu1 %v900_v0  ;;  %s218_s11 = scalar_lea.vmem %s1060_s0, %s684_s8  ;;  %s225_s21 = scalar_lea.vmem %s1061_s1, %s684_s8  ;;  %v903_v33 = vmov 0   ;;  %vm514_vm5 = vcmask 1043456  }
  0x19   : > { %v237_v5 = vld [vmem:[%s218_s11] sm:$0xff]  ;;  %vm475_vm3 = vcmp.ge.s32.totalorder %v468_v24, %v472_v25  ;;  %808 = vset.pattern.permute.xlu0 %v903_v33  ;;  %809 = vset.pattern.permute.xlu1 %v903_v33  ;;  %s822_s11 = scalar_lea.vmem %s590_s6, 128  ;;  %s828_s15 = scalar_lea.vmem %s827_s19, 256 }
  0x1a   : > { %v306_v6 = vld [vmem:[%s225_s21] sm:$0xff]  ;;  %v238_v7 = vpack.c.bf16 %v237_v5, %v237_v5  ;;  %p823_p12 = scmp.ne.s32.totalorder %s590_s6, %s822_s11  ;;  %p830_p2 = scmp.lt.s32.totalorder %s828_s15, %s822_s11 }
  0x1b   : > { %716 = vmatpush3.bf16.msra.mxu0 %v812_v3  ;;  %724 = vmatpush3.bf16.msra.mxu1 %v813_v4  ;;  %v307_v8 = vpack.c.bf16 %v306_v6, %v306_v6 }
  0x1c   : > { %729 = vmatprep.subr.bf16.mxu0 %v900_v0  ;;  %737 = vmatprep.subr.bf16.mxu1 %v900_v0  ;;  %p824_p13 = pnand %p823_p12, %p965_p4  ;;  %p831_p3 = por %p830_p2, %p829_p1 }
  0x1e   : > { %718 = vmatmul.mubr.msk.bf16.vlgmr.msra.gmra.mxu0 %vm255_vm1, %v238_v7  ;;  %726 = vmatmul.mubr.msk.bf16.vlgmr.msra.gmra.mxu1 %vm255_vm1, %v307_v8  ;;  %v477_v34 = vld [vmem:[#allocation3] sm:$0xff]  ;;  %v494_v52 = vld [vmem:[#allocation4] sm:$0xff]  ;;  %p825_p0 = pneg %p824_p13 }
  0x1f   : > { %739 = vmatprep.mubr.msk.bf16.mxu1 %vm901_vm0, %v900_v0  ;;  %733 = vmatprep.mubr.msk.bf16.mxu0 %vm901_vm0, %v900_v0 }
  0x20   : > { %730 = vmatpush3.bf16.msra.mxu0 %v814_v20  ;;  %p832_p5 = pnand %p831_p3, %p825_p0 }
  0x21   : > { %731 = vmatprep.subr.bf16.mxu0 %v900_v0 }
  0x24   : > { %732 = vmatpush3.bf16.msra.mxu0 %v815_v22 }
  0x25   : > { %743 = vmatprep.subr.bf16.mxu0 %v900_v0 }
  0x27   : > { %734 = vmatmul.mubr.msk.bf16.vlgmr.msra.gmra.mxu0 %vm255_vm1, %v307_v8 }
  0x28   : > { %745 = vmatprep.mubr.msk.bf16.mxu0 %vm901_vm0, %v900_v0 }
  0xde   : > { %v293_v9 = vpop.f32.mrf.mxu0  ;;  %v362_v10 = vpop.f32.mrf.mxu1 }
  0xdf   : > { %v299_v11 = vpack.c.bf16 %v293_v9, %v293_v9  ;;  %v425_v12 = vpack.c.bf16 %v362_v10, %v362_v10 }
  0xe0   : > { %v719_v13 = vpop.f32.mrf.mxu0  ;;  %v727_v14 = vpop.f32.mrf.mxu1 }
  0xe1   : > { %300 = vst [vmem:[#allocation2] sm:$0xf] %v299_v11  ;;  %738 = vmatpush3.bf16.xpose.msra.mxu1 %v425_v12 }
  0xe2   : > { %v296_v15 = vpop.f32.mrf.mxu0  ;;  %v365_v16 = vpop.f32.mrf.mxu1 }
  0xe4   : > { %v720_v17 = vpop.f32.mrf.mxu0  ;;  %v728_v18 = vpop.f32.mrf.mxu1 }
  0xe7   : > { %v418_v38 = vpop.f32.mrf.mxu0 }
  0xe8   : > { %v424_v19 = vld [vmem:[#allocation2] sm:$0xf]  ;;  %v510_v39 = vpack.c.bf16 %v418_v38, %v418_v38 }
  0xe9   : > { %740 = vmatmul.mubr.bf16.vlgmr.msra.gmra.mxu1 %v424_v19  ;;  %v735_v40 = vpop.f32.mrf.mxu0 }
  0xea   : > { %v516_v41 = vsel %vm514_vm5, %v510_v39, 0 }
  0xeb   : > { %744 = vmatpush3.bf16.msra.mxu0 %v516_v41  ;;  %v421_v42 = vpop.f32.mrf.mxu0 }
  0xed   : > { %v736_v43 = vpop.f32.mrf.mxu0 }
 0x1a9   : > { %v460_v26 = vpop.f32.mrf.mxu1 }
 0x1aa   : > { %v466_v27 = vmul.f32 0.17677669, %v460_v26 }
 0x1ab   : > { %v741_v28 = vpop.f32.mrf.mxu1 }
 0x1ac   : > { %v476_v29 = vsel %vm475_vm3, %v466_v27, -inf }
 0x1ad   : > { %v463_v30 = vpop.f32.mrf.mxu1  ;;  %v479_v31 = vsel %vm478_vm4, %v476_v29, -inf }
 0x1ae   : > { %480 = vmax.xlane.f32.xlu0 %v479_v31 }
 0x1af   : > { %v742_v32 = vpop.f32.mrf.mxu1 }
 0x237   : > { %v481_v35 = vpop.xlane.xlu0 %480 }
 0x238   : > { %v482_v36 = vmax.f32 %v477_v34, %v481_v35 }
 0x23a   : > { %v483_v37 = vsub.f32 %v477_v34, %v482_v36  ;;  %560 = vst.msk [vmem:[#allocation3] sm:$0xff] %vm233_vm2, %v482_v36  ;;  %488 = vperm.xlu0 %808, %v482_v36  }
 0x23c   : > { %v484_v48 = vmul.f32 1.442695, %v483_v37 }
 0x2b5   : > { %v489_v44 = vpop.permute.xlu0 %488 }
 0x2b6   : > { %v491_v45 = vsub.f32 %v476_v29, %v489_v44 }
 0x2b8   : > { %v492_v46 = vmul.f32 1.442695, %v491_v45 }
 0x2ba   : > { %816 = vpow2.f32 %v492_v46 }
 0x2bb   : > { %818 = vpow2.f32 %v484_v48 }
 0x2c7   : > { %v817_v47 = vpop.eup %816 }
 0x2c8   : > { %v496_v49 = vsel %vm478_vm4, %v817_v47, 0.0  ;;  %v509_v50 = vpack.c.bf16 %v817_v47, %v817_v47  ;;  %v819_v51 = vpop.eup %818 }
 0x2c9   : > { %497 = vadd.xlane.f32.xlu1 %v496_v49  ;;  %v495_v53 = vmul.f32 %v819_v51, %v494_v52 }
 0x2ca   : > { %746 = vmatmul.mubr.msk.bf16.vlgmr.msra.gmra.mxu0 %vm478_vm4, %v509_v50 }
 0x2da   : > { %505 = vperm.xlu1 %809, %v819_v51  }
 0x352   : > { %v498_v54 = vpop.xlane.xlu1 %497 }
 0x353   : > { %v499_v55 = vadd.f32 %v498_v54, %v495_v53 }
 0x355   : > { %501 = vst.msk [vmem:[#allocation4] sm:$0xff] %vm233_vm2, %v499_v55 }
 0x356   : > { %v506_v62 = vpop.permute.xlu1 %505 }
 0x357   : > { %v508_v63 = vmul.f32 0.0, %v506_v62 }
 0x35c   : > { %v564_v56 = vld [vmem:[#allocation4] sm:$0xff] }
 0x35d   : > { %820 = vrcp.f32 %v564_v56 }
 0x36a   : > { %v821_v57 = vpop.eup %820 }
 0x36b   : > { %569 = vperm.xlu1 %809, %v821_v57  }
 0x38a   : > { %v552_v58 = vpop.f32.mrf.mxu0 }
 0x38b   : > { %v558_v0 = vadd.f32 %v552_v58, %v508_v63 }
 0x38c   : > { %v747_v59 = vpop.f32.mrf.mxu0 }
 0x38e   : > { %v555_v60 = vpop.f32.mrf.mxu0 }
 0x390   : > { %v748_v61 = vpop.f32.mrf.mxu0 }
 0x3e6   : > { %v570_v1 = vpop.permute.xlu1 %569 }
 0x3e7   : > { %v572_v2 = vmul.f32 %v570_v1, %v558_v0 }
 0x3e9   : > { %573 = vst [vmem:[%s211_s5] sm:$0xff] %v572_v2 }
 0x3ea   : > { %835 = shalt.err (!%p832_p5)
}
 0x3eb   : > { %s836_s21 = scalar_lea.hbm %s587_s9, 128  ;;  %s840_s27 = scalar_lea.hbm %s1063_s3, 256 }
 0x3ec   : > { %p837_p6 = scmp.ne.s32.totalorder %s587_s9, %s836_s21  ;;  %p841_p10 = scmp.lt.s32.totalorder %s587_s9, %s1063_s3 }
 0x3ed   : > { %p842_p11 = scmp.lt.s32.totalorder %s840_s27, %s836_s21 }
 0x3ee   : > { %p838_p7 = pnand %p837_p6, %p965_p4 }
 0x3ef   : > { %p843_p12 = por %p842_p11, %p841_p10 }
 0x3f0   : > { %p839_p9 = pneg %p838_p7 }
 0x3f2   : > { %p844_p13 = pnand %p843_p12, %p839_p9 }
 0x3f4   : > { %847 = shalt.err (!%p844_p13)
}
 0x3f5   : > { %749 = dma.vmem_to_hbm [thread:$0]  (%p965_p4), %s590_s6, 128, %s587_s9, %s575_s10  }
 0x3f6 PF: > { %p755_p0 = scmp.ge.s32.totalorder %s898_s17, 2  ;;  %s601_s30 = sand.u32 1, %s878_s12  }
 0x3f7   : > { %s602_s4 = scalar_lea.sflag [#allocation7], %s601_s30 }
 0x3f8   : > { %p752_p1 = pnand %p755_p0, %p972_p8 }
 0x3fa   : > { %p753_p2 = pneg %p752_p1 }
 0x3fc   : > { %873 = dma.done.wait (%p753_p2), %s602_s4, 128  }
 0x3fd   : > { %875 = vsyncadd (%p753_p2), %s602_s4, 4294967168  ;;  %s16_s17 = sadd.s32 1, %s898_s17   ;;  %s1066_s12 = smov %s882_s13 }
 0x3fe   : > { %p13_p3 = scmp.ge.s32.totalorder %s16_s17, 4   ;;  %s1067_s13 = smov %s886_s14 }
 0x3ff   : > { %s1068_s14 = smov %s978_s25  ;;  %s1069_s15 = smov %s894_s16 }
 0x400   : > { %s1070_s16 = smov %s1072_s20  ;;  %15 = sbr.rel (!%p13_p3) target bundleno = 4 (0x4), region = 82 }
 0x405   :  { %607 = vsyncpa [#allocation7], 1 }
 0x406   :  { %609 = vsyncpa [#allocation7 + $0x1], 1 }

</bundles_post_ra>
